<compile_context>
chip_gen: v5e
topology: v5e:2x2
jax: 0.10.0
libtpu: 0.0.40
codegen_flags: <defaults>
</compile_context>

<pallas_src>
import jax
import jax.numpy as jnp
import numpy as np
from jax.experimental import pallas as pl
from jax.experimental.pallas import tpu as pltpu

# ------------------------- model configuration ------------------------------
N_BATCH = 2       # batch
C_IN    = 4       # input channels
H = W   = 16      # spatial
C_MID   = 32      # hidden channels of the 3x3 conv
C_OUT   = 8       # number of segmentation classes
KH = KW = 3       # 3x3 conv, padding=1, stride=1

K_TAPS = KH * KW * C_IN          # 36  (true im2col contraction depth)
K_EXT  = K_TAPS + 1              # 37  (+1 ones row carries b1)
M_EXT  = C_MID + 1               # 33  (+1 constant-1 channel carries b2)
ROWS   = N_BATCH * H * W         # 512 (batch folded into the lane dimension)


# ------------------------------ Pallas kernel --------------------------------
def fcn_head_kernel(xT_ref, w1_ref, w2_ref, oT_ref):
    """Single invocation (no grid); everything resident in VMEM.

    xT_ref : (K_EXT, ROWS)    im2col patches, transposed; last row is all ones
    w1_ref : (M_EXT, K_EXT)   rows 0..31 = [w1^T | b1]; row 32 selects the ones
                              row so hidden channel 32 is relu(1) == 1
    w2_ref : (C_OUT, M_EXT)   [w2^T | b2]
    oT_ref : (C_OUT, ROWS)    logits, transposed (lane-dense: 512 % 128 == 0)
    """
    # 3x3 conv (+ fused b1) as one (33,37)x(37,512) MXU matmul, then ReLU.
    hT = jnp.dot(w1_ref[...], xT_ref[...], preferred_element_type=jnp.float32)
    hT = jnp.maximum(hT, 0.0)                 # row 32 stays exactly 1.0

    # 1x1 conv (+ fused b2) as one (8,33)x(33,512) MXU matmul.
    oT_ref[...] = jnp.dot(w2_ref[...], hT, preferred_element_type=jnp.float32)


# ------------------------------ wrapper --------------------------------------
@jax.jit
def no_dict_model_forward(x_nchw, params):
    """Equivalent of NoDictModel(model)(inp): run the inner model, take ['out'].

    x_nchw: (N, C_IN, H, W) float32
    returns (N, C_OUT, H, W) float32 logits  (PyTorch NCHW convention)
    """
    w1, b1, w2, b2 = params

    # NCHW -> NHWC, pad spatial dims by 1 (conv padding=1)
    x_nhwc = jnp.transpose(x_nchw, (0, 2, 3, 1))
    x_pad = jnp.pad(x_nhwc, ((0, 0), (1, 1), (1, 1), (0, 0)))

    # im2col (no K padding), tap order (kh, kw, cin) matching w1.reshape(36, 32).
    taps = [x_pad[:, kh:kh + H, kw:kw + W, :]
            for kh in range(KH) for kw in range(KW)]
    xp = jnp.concatenate(taps, axis=-1).reshape(ROWS, K_TAPS)        # (512, 36)
    xT_ext = jnp.concatenate([xp.T, jnp.ones((1, ROWS), jnp.float32)], axis=0)

    # Layer-1 weights: rows 0..31 = [w1^T | b1]; row 32 = e_{36} so that the
    # extra hidden channel is relu(1) == 1 and can carry b2 through layer 2.
    w1_ext = jnp.zeros((M_EXT, K_EXT), jnp.float32)
    w1_ext = w1_ext.at[:C_MID, :K_TAPS].set(w1.reshape(K_TAPS, C_MID).T)
    w1_ext = w1_ext.at[:C_MID, K_TAPS].set(b1.reshape(C_MID))
    w1_ext = w1_ext.at[C_MID, K_TAPS].set(1.0)

    # Layer-2 weights: [w2^T | b2]
    w2_ext = jnp.concatenate([w2.T, b2.reshape(C_OUT, 1)], axis=1)   # (8, 33)

    flops = 2 * (M_EXT * K_EXT * ROWS + C_OUT * M_EXT * ROWS)
    bytes_accessed = 4 * (K_EXT * ROWS + M_EXT * K_EXT
                          + C_OUT * M_EXT + C_OUT * ROWS)

    oT = pl.pallas_call(
        fcn_head_kernel,
        out_shape=jax.ShapeDtypeStruct((C_OUT, ROWS), jnp.float32),
        in_specs=[
            pl.BlockSpec(memory_space=pltpu.MemorySpace.VMEM),
            pl.BlockSpec(memory_space=pltpu.MemorySpace.VMEM),
            pl.BlockSpec(memory_space=pltpu.MemorySpace.VMEM),
        ],
        out_specs=pl.BlockSpec(memory_space=pltpu.MemorySpace.VMEM),
        cost_estimate=pl.CostEstimate(flops=flops, transcendentals=0,
                                      bytes_accessed=bytes_accessed),
    )(xT_ext, w1_ext, w2_ext)

    # (C_OUT, N*H*W) -> (N, C_OUT, H, W)  (PyTorch NCHW convention)
    return jnp.transpose(oT.reshape(C_OUT, N_BATCH, H, W), (1, 0, 2, 3))


# --------------------------- pure-JAX reference -------------------------------
def reference_forward(x_nchw, params):
    w1, b1, w2, b2 = params
    x = jnp.transpose(x_nchw, (0, 2, 3, 1))                          # NHWC
    h = jax.lax.conv_general_dilated(
        x, w1, window_strides=(1, 1), padding="SAME",
        dimension_numbers=("NHWC", "HWIO", "NHWC"),
        precision=jax.lax.Precision.HIGHEST)
    h = jnp.maximum(h + b1.reshape(1, 1, 1, C_MID), 0.0)
    y = jnp.einsum("nhwc,cd->nhwd", h, w2,
                   precision=jax.lax.Precision.HIGHEST) + b2.reshape(1, 1, 1, C_OUT)
    return jnp.transpose(y, (0, 3, 1, 2))                            # NCHW


# --------------------------------- main ---------------------------------------
if __name__ == "__main__":
    key = jax.random.PRNGKey(0)
    k_x, k_w1, k_b1, k_w2, k_b2 = jax.random.split(key, 5)

    # deterministic synthetic parameters
    w1 = jax.random.normal(k_w1, (KH, KW, C_IN, C_MID), jnp.float32) * 0.1
    b1 = jax.random.normal(k_b1, (1, C_MID), jnp.float32) * 0.1
    w2 = jax.random.normal(k_w2, (C_MID, C_OUT), jnp.float32) * 0.1
    b2 = jax.random.normal(k_b2, (1, C_OUT), jnp.float32) * 0.1
    params = (w1, b1, w2, b2)

    # deterministic input, NCHW like the PyTorch module would receive
    x = jax.random.normal(k_x, (N_BATCH, C_IN, H, W), jnp.float32)

    out = no_dict_model_forward(x, params)
    out = jax.block_until_ready(out)

    ref = jax.block_until_ready(reference_forward(x, params))
    assert out.shape == (N_BATCH, C_OUT, H, W)
    assert np.allclose(np.asarray(out), np.asarray(ref), atol=1e-4, rtol=1e-4)

    print("KERNEL_OK")
</pallas_src>

<mosaic_0001>
module attributes {stable_mosaic.version = 11 : i64} {
  func.func @fcn_head_kernel(%arg0: memref<37x512xf32, #tpu.memory_space<vmem>>, %arg1: memref<33x37xf32, #tpu.memory_space<vmem>>, %arg2: memref<8x33xf32, #tpu.memory_space<vmem>>, %arg3: memref<8x512xf32, #tpu.memory_space<vmem>>) attributes {dimension_semantics = [], scalar_prefetch = 0 : i64, scratch_operands = 0 : i64, tpu.core_type = #tpu.core_type<tc>} {
    %c0 = arith.constant 0 : index
    %c0_0 = arith.constant 0 : index
    %0 = vector.load %arg1[%c0, %c0_0] : memref<33x37xf32, #tpu.memory_space<vmem>>, vector<33x37xf32>
    %c0_1 = arith.constant 0 : index
    %c0_2 = arith.constant 0 : index
    %1 = vector.load %arg0[%c0_1, %c0_2] : memref<37x512xf32, #tpu.memory_space<vmem>>, vector<37x512xf32>
    %cst = arith.constant dense<0.000000e+00> : vector<33x512xf32>
    %2 = tpu.matmul %0, %1, %cst {dimension_numbers = #tpu.dot_dimension_numbers<[1], [0], [0], [1], [0, 0, 1, 1], [], []>} : vector<33x37xf32>, vector<37x512xf32>, vector<33x512xf32> -> vector<33x512xf32>
    %cst_3 = arith.constant 0.000000e+00 : f32
    %3 = vector.broadcast %cst_3 : f32 to vector<33x512xf32>
    %4 = arith.maximumf %2, %3 : vector<33x512xf32>
    %c0_4 = arith.constant 0 : index
    %c0_5 = arith.constant 0 : index
    %5 = vector.load %arg2[%c0_4, %c0_5] : memref<8x33xf32, #tpu.memory_space<vmem>>, vector<8x33xf32>
    %cst_6 = arith.constant dense<0.000000e+00> : vector<8x512xf32>
    %6 = tpu.matmul %5, %4, %cst_6 {dimension_numbers = #tpu.dot_dimension_numbers<[1], [0], [0], [1], [0, 0, 1, 1], [], []>} : vector<8x33xf32>, vector<33x512xf32>, vector<8x512xf32> -> vector<8x512xf32>
    %c0_7 = arith.constant 0 : index
    %c0_8 = arith.constant 0 : index
    %7 = vector.load %arg3[%c0_7, %c0_8] : memref<8x512xf32, #tpu.memory_space<vmem>>, vector<8x512xf32>
    tpu.vector_store %arg3[%c0_7, %c0_8], %6 {strides = array<i32>} : memref<8x512xf32, #tpu.memory_space<vmem>>, vector<8x512xf32>,
    return
  }
}

</mosaic_0001>

<bundles_post_ra>
// kernel: no_dict_model_forward.1
= control target key start
LH: loop header
LB: loop body
LE: loop exit
PB: predicated region body
PF: predicated region fallthrough
CT: control target
= control target key end

     0   :  { %vm55_vm0 = vcmask 1044480   ;;  %vm39_vm1 = vcmask 302080   ;;  %vm221_vm2 = vcmask 1040384   ;;  %vm217_vm3 = vcmask 269312   ;;  %s488_s0 = inlined_call_operand.vmem [shape: f32[37,512], index: 0, kind: input, shape index: {}]   ;;  %s489_s1 = inlined_call_operand.vmem [shape: f32[33,37], index: 1, kind: input, shape index: {}]   ;;  %s490_s2 = inlined_call_operand.vmem [shape: f32[8,33], index: 2, kind: input, shape index: {}]   ;;  %s491_s3 = inlined_call_operand.vmem [shape: f32[8,512], index: 3, kind: output, shape index: {}]  }
   0x1   :  { %v35_v0 = vld [vmem:[%s488_s0 + $0x80] sm:$0x1f]  ;;  %v36_v1 = vld [vmem:[%s488_s0 + $0x88] sm:$0x1f]  ;;  %v37_v2 = vld [vmem:[%s488_s0 + $0x90] sm:$0x1f] }
   0x2   :  { %322 = vmatpush.msk.msra.mxu0 %vm55_vm0, %v35_v0  ;;  %328 = vmatpush.msk.msra.mxu1 %vm55_vm0, %v36_v1  ;;  %v38_v3 = vld [vmem:[%s488_s0 + $0x98] sm:$0x1f]  ;;  %v31_v4 = vld [vmem:[%s488_s0 + $0x60] sm:$0xff]  ;;  %v32_v5 = vld [vmem:[%s488_s0 + $0x68] sm:$0xff] }
   0x3   :  { %334 = vmatpush.msk.msra.mxu2 %vm55_vm0, %v37_v2  ;;  %340 = vmatpush.msk.msra.mxu3 %vm55_vm0, %v38_v3  ;;  %v33_v6 = vld [vmem:[%s488_s0 + $0x70] sm:$0xff]  ;;  %v34_v7 = vld [vmem:[%s488_s0 + $0x78] sm:$0xff]  ;;  %v27_v8 = vld [vmem:[%s488_s0 + $0x40] sm:$0xff] }
   0x4   :  { %80 = vmatpush.msra.mxu0 %v31_v4  ;;  %112 = vmatpush.msra.mxu1 %v32_v5  ;;  %v28_v9 = vld [vmem:[%s488_s0 + $0x48] sm:$0xff]  ;;  %v29_v10 = vld [vmem:[%s488_s0 + $0x50] sm:$0xff]  ;;  %v30_v11 = vld [vmem:[%s488_s0 + $0x58] sm:$0xff] }
   0x5   :  { %144 = vmatpush.msra.mxu2 %v33_v6  ;;  %176 = vmatpush.msra.mxu3 %v34_v7  ;;  %v23_v12 = vld [vmem:[%s488_s0 + $0x20] sm:$0xff]  ;;  %v24_v13 = vld [vmem:[%s488_s0 + $0x28] sm:$0xff]  ;;  %v25_v14 = vld [vmem:[%s488_s0 + $0x30] sm:$0xff] }
   0x6   :  { %81 = vmatpush.msra.mxu0 %v27_v8  ;;  %113 = vmatpush.msra.mxu1 %v28_v9  ;;  %v26_v15 = vld [vmem:[%s488_s0 + $0x38] sm:$0xff]  ;;  %v19_v16 = vld [vmem:[%s488_s0] sm:$0xff]  ;;  %v20_v17 = vld [vmem:[%s488_s0 + $0x8] sm:$0xff] }
   0x7   :  { %145 = vmatpush.msra.mxu2 %v29_v10  ;;  %177 = vmatpush.msra.mxu3 %v30_v11  ;;  %v21_v18 = vld [vmem:[%s488_s0 + $0x10] sm:$0xff]  ;;  %v22_v19 = vld [vmem:[%s488_s0 + $0x18] sm:$0xff]  ;;  %v14_v20 = vld [vmem:[%s489_s1] sm:$0xff] }
   0x8   :  { %82 = vmatpush.msra.mxu0 %v23_v12  ;;  %114 = vmatpush.msra.mxu1 %v24_v13  ;;  %v15_v21 = vld [vmem:[%s489_s1 + $0x8] sm:$0xff]  ;;  %v16_v22 = vld [vmem:[%s489_s1 + $0x10] sm:$0xff]  ;;  %v17_v23 = vld [vmem:[%s489_s1 + $0x18] sm:$0xff] }
   0x9   :  { %146 = vmatpush.msra.mxu2 %v25_v14  ;;  %178 = vmatpush.msra.mxu3 %v26_v15  ;;  %v18_v24 = vld [vmem:[%s489_s1 + $0x20] sm:$0x1] }
   0xa   :  { %83 = vmatpush.msra.mxu0 %v19_v16  ;;  %115 = vmatpush.msra.mxu1 %v20_v17  ;;  %v216_v61 = vld [vmem:[%s490_s2] sm:$0xff] }
   0xb   :  { %147 = vmatpush.msra.mxu2 %v21_v18  ;;  %179 = vmatpush.msra.mxu3 %v22_v19 }
   0xc   :  { %323 = vmatmul.msk.f32.vlgmr.msra.gmra.mxu0 %vm39_vm1, %v14_v20  ;;  %329 = vmatmul.msk.f32.vlgmr.msra.gmra.mxu1 %vm39_vm1, %v14_v20 }
   0xd   :  { %335 = vmatmul.msk.f32.vlgmr.msra.gmra.mxu2 %vm39_vm1, %v14_v20  ;;  %341 = vmatmul.msk.f32.vlgmr.msra.gmra.mxu3 %vm39_vm1, %v14_v20 }
  0x14   :  { %324 = vmatmul.msk.f32.gmra.mxu0 %vm39_vm1, %v15_v21  ;;  %330 = vmatmul.msk.f32.gmra.mxu1 %vm39_vm1, %v15_v21 }
  0x15   :  { %336 = vmatmul.msk.f32.gmra.mxu2 %vm39_vm1, %v15_v21  ;;  %342 = vmatmul.msk.f32.gmra.mxu3 %vm39_vm1, %v15_v21 }
  0x1c   :  { %325 = vmatmul.msk.f32.gmra.mxu0 %vm39_vm1, %v16_v22  ;;  %331 = vmatmul.msk.f32.gmra.mxu1 %vm39_vm1, %v16_v22 }
  0x1d   :  { %337 = vmatmul.msk.f32.gmra.mxu2 %vm39_vm1, %v16_v22  ;;  %343 = vmatmul.msk.f32.gmra.mxu3 %vm39_vm1, %v16_v22 }
  0x24   :  { %326 = vmatmul.msk.f32.gmra.mxu0 %vm39_vm1, %v17_v23  ;;  %332 = vmatmul.msk.f32.gmra.mxu1 %vm39_vm1, %v17_v23 }
  0x25   :  { %338 = vmatmul.msk.f32.gmra.mxu2 %vm39_vm1, %v17_v23  ;;  %344 = vmatmul.msk.f32.gmra.mxu3 %vm39_vm1, %v17_v23 }
  0x2c   :  { %327 = vmatmul.msk.f32.gmra.mxu0 %vm39_vm1, %v18_v24  ;;  %333 = vmatmul.msk.f32.gmra.mxu1 %vm39_vm1, %v18_v24 }
  0x2d   :  { %339 = vmatmul.msk.f32.gmra.mxu2 %vm39_vm1, %v18_v24  ;;  %345 = vmatmul.msk.f32.gmra.mxu3 %vm39_vm1, %v18_v24 }
  0x89   :  { %v85_v25 = vpop.f32.mrf.mxu0  ;;  %v117_v26 = vpop.f32.mrf.mxu1 }
  0x8a   :  { %v196_v55 = vmax.f32 %v85_v25, 0.0  ;;  %v197_v56 = vmax.f32 %v117_v26, 0.0 }
  0x90   :  { %v149_v27 = vpop.f32.mrf.mxu2  ;;  %v181_v28 = vpop.f32.mrf.mxu3 }
  0x91   :  { %v88_v29 = vpop.f32.mrf.mxu0  ;;  %v120_v30 = vpop.f32.mrf.mxu1  ;;  %v198_v0 = vmax.f32 %v149_v27, 0.0  ;;  %v199_v1 = vmax.f32 %v181_v28, 0.0 }
  0x92   :  { %v200_v49 = vmax.f32 %v88_v29, 0.0  ;;  %v201_v50 = vmax.f32 %v120_v30, 0.0 }
  0x98   :  { %v152_v31 = vpop.f32.mrf.mxu2  ;;  %v184_v32 = vpop.f32.mrf.mxu3 }
  0x99   :  { %v91_v33 = vpop.f32.mrf.mxu0  ;;  %v123_v34 = vpop.f32.mrf.mxu1  ;;  %v202_v62 = vmax.f32 %v152_v31, 0.0  ;;  %v203_v63 = vmax.f32 %v184_v32, 0.0 }
  0x9a   :  { %v204_v47 = vmax.f32 %v91_v33, 0.0  ;;  %v205_v48 = vmax.f32 %v123_v34, 0.0 }
  0xa0   :  { %v155_v35 = vpop.f32.mrf.mxu2  ;;  %v187_v36 = vpop.f32.mrf.mxu3 }
  0xa1   :  { %v94_v37 = vpop.f32.mrf.mxu0  ;;  %v126_v38 = vpop.f32.mrf.mxu1  ;;  %v206_v59 = vmax.f32 %v155_v35, 0.0  ;;  %v207_v60 = vmax.f32 %v187_v36, 0.0 }
  0xa2   :  { %v208_v43 = vmax.f32 %v94_v37, 0.0  ;;  %v209_v44 = vmax.f32 %v126_v38, 0.0 }
  0xa8   :  { %v158_v39 = vpop.f32.mrf.mxu2  ;;  %v190_v40 = vpop.f32.mrf.mxu3 }
  0xa9   :  { %v97_v41 = vpop.f32.mrf.mxu0  ;;  %v129_v42 = vpop.f32.mrf.mxu1  ;;  %v210_v57 = vmax.f32 %v158_v39, 0.0  ;;  %v211_v58 = vmax.f32 %v190_v40, 0.0 }
  0xaa   :  { %v212_v45 = vmax.f32 %v97_v41, 0.0  ;;  %v213_v46 = vmax.f32 %v129_v42, 0.0 }
  0xac   :  { %346 = vmatpush.msk.msrb.mxu0 %vm221_vm2, %v212_v45  ;;  %348 = vmatpush.msk.msrb.mxu1 %vm221_vm2, %v213_v46 }
  0xae   :  { %246 = vmatpush.msrb.mxu0 %v208_v43  ;;  %266 = vmatpush.msrb.mxu1 %v209_v44 }
  0xb0   :  { %v161_v51 = vpop.f32.mrf.mxu2  ;;  %v193_v52 = vpop.f32.mrf.mxu3  ;;  %247 = vmatpush.msrb.mxu0 %v204_v47  ;;  %267 = vmatpush.msrb.mxu1 %v205_v48 }
  0xb1   :  { %v214_v53 = vmax.f32 %v161_v51, 0.0  ;;  %v215_v54 = vmax.f32 %v193_v52, 0.0 }
  0xb2   :  { %248 = vmatpush.msrb.mxu0 %v200_v49  ;;  %268 = vmatpush.msrb.mxu1 %v201_v50 }
  0xb3   :  { %350 = vmatpush.msk.msrb.mxu2 %vm221_vm2, %v214_v53  ;;  %352 = vmatpush.msk.msrb.mxu3 %vm221_vm2, %v215_v54 }
  0xb4   :  { %249 = vmatpush.msrb.mxu0 %v196_v55  ;;  %269 = vmatpush.msrb.mxu1 %v197_v56 }
  0xb5   :  { %286 = vmatpush.msrb.mxu2 %v210_v57  ;;  %306 = vmatpush.msrb.mxu3 %v211_v58 }
  0xb6   :  { %347 = vmatmul.msk.f32.vlgmr.msrb.gmra.mxu0 %vm217_vm3, %v216_v61  ;;  %349 = vmatmul.msk.f32.vlgmr.msrb.gmra.mxu1 %vm217_vm3, %v216_v61 }
  0xb7   :  { %287 = vmatpush.msrb.mxu2 %v206_v59  ;;  %307 = vmatpush.msrb.mxu3 %v207_v60 }
  0xb9   :  { %288 = vmatpush.msrb.mxu2 %v202_v62  ;;  %308 = vmatpush.msrb.mxu3 %v203_v63 }
  0xbb   :  { %289 = vmatpush.msrb.mxu2 %v198_v0  ;;  %309 = vmatpush.msrb.mxu3 %v199_v1 }
  0xbc   :  { %351 = vmatmul.msk.f32.vlgmr.msrb.gmra.mxu2 %vm217_vm3, %v216_v61  ;;  %353 = vmatmul.msk.f32.vlgmr.msrb.gmra.mxu3 %vm217_vm3, %v216_v61 }
 0x133   :  { %v251_v2 = vpop.f32.mrf.mxu0  ;;  %v271_v3 = vpop.f32.mrf.mxu1 }
 0x134   :  { %314 = vst [vmem:[%s491_s3] sm:$0xff] %v251_v2 }
 0x135   :  { %315 = vst [vmem:[%s491_s3 + $0x8] sm:$0xff] %v271_v3 }
 0x13f   :  { %v291_v4 = vpop.f32.mrf.mxu2  ;;  %v311_v5 = vpop.f32.mrf.mxu3 }
 0x140   :  { %316 = vst [vmem:[%s491_s3 + $0x10] sm:$0xff] %v291_v4 }
 0x141   :  { %317 = vst [vmem:[%s491_s3 + $0x18] sm:$0xff] %v311_v5 }

</bundles_post_ra>
